<compile_context>
chip_gen: v7x
topology: tpu7x:2x2x1
jax: 0.10.0
libtpu: 0.0.40
codegen_flags: <defaults>
</compile_context>

<pallas_src>
import jax
import jax.numpy as jnp
from jax.experimental import pallas as pl
from jax.experimental.pallas import tpu as pltpu

NEG_INF = -1e30  # large finite negative: exp() underflows to 0, no inf-inf NaNs
VMEM_LIMIT = 64 * 1024 * 1024  # fits v7x's 64 MiB VMEM; tiles below stay < ~16 MiB


def _make_lse_kernel(vocab, tv, mask_vocab):
    """Pass 1: online row-wise logsumexp over vocab tiles."""

    def kernel(x_ref, w_ref, b_ref, lse_ref, m_ref, l_ref):
        j = pl.program_id(1)

        @pl.when(j == 0)
        def _():
            m_ref[...] = jnp.full_like(m_ref, NEG_INF)
            l_ref[...] = jnp.zeros_like(l_ref)

        # bf16 x bf16 -> f32 accumulation on the MXU
        logits = jnp.dot(x_ref[...], w_ref[...],
                         preferred_element_type=jnp.float32)
        logits = logits + b_ref[...]
        if mask_vocab:
            # last vocab tile is partial: kill the out-of-range columns
            col = j * tv + jax.lax.broadcasted_iota(jnp.int32, logits.shape, 1)
            logits = jnp.where(col < vocab, logits, NEG_INF)

        m_prev = m_ref[...]
        m_new = jnp.maximum(m_prev, jnp.max(logits, axis=-1, keepdims=True))
        alpha = jnp.exp(m_prev - m_new)
        l_ref[...] = alpha * l_ref[...] + jnp.sum(
            jnp.exp(logits - m_new), axis=-1, keepdims=True)
        m_ref[...] = m_new

        @pl.when(j == pl.num_programs(1) - 1)
        def _():
            lse_ref[...] = m_ref[...] + jnp.log(l_ref[...])

    return kernel


def _normalize_kernel(x_ref, w_ref, b_ref, lse_ref, o_ref):
    """Pass 2: recompute logits tile and write logits - lse (lane-dense store)."""
    logits = jnp.dot(x_ref[...], w_ref[...], preferred_element_type=jnp.float32)
    o_ref[...] = (logits + b_ref[...] - lse_ref[...]).astype(o_ref.dtype)


def generator_forward(x, w_t, bias, *, tm=512, tv=2048,
                      matmul_dtype=jnp.bfloat16, out_dtype=None):
    """log_softmax(x @ w_t + bias, axis=-1).

    x    : [..., d_model]
    w_t  : [d_model, vocab]   -- weight stored PRE-transposed (no per-call .T)
    bias : [vocab]
    """
    orig_shape = x.shape
    d_model = orig_shape[-1]
    vocab = w_t.shape[1]
    out_dtype = out_dtype or x.dtype

    x2d = x.reshape(-1, d_model).astype(matmul_dtype)
    w_t = w_t.astype(matmul_dtype)        # no-op if already stored in bf16
    b2d = bias.reshape(1, vocab).astype(jnp.float32)
    n_rows = x2d.shape[0]

    # clamp tiles to the array extents (small shapes); edge tiles are masked
    tm_eff = tm if n_rows > tm else n_rows
    tv_eff = tv if vocab > tv else vocab
    n_rtiles = pl.cdiv(n_rows, tm_eff)
    n_vtiles = pl.cdiv(vocab, tv_eff)
    mask_vocab = (vocab % tv_eff) != 0

    x_bytes = x2d.size * x2d.dtype.itemsize
    w_bytes = w_t.size * w_t.dtype.itemsize

    # ---------------- pass 1: row-wise logsumexp ----------------
    lse = pl.pallas_call(
        _make_lse_kernel(vocab, tv_eff, mask_vocab),
        out_shape=jax.ShapeDtypeStruct((n_rows, 1), jnp.float32),
        grid_spec=pltpu.PrefetchScalarGridSpec(
            num_scalar_prefetch=0,
            grid=(n_rtiles, n_vtiles),            # rows outer, vocab inner
            in_specs=[
                pl.BlockSpec((tm_eff, d_model), lambda i, j: (i, 0)),
                pl.BlockSpec((d_model, tv_eff), lambda i, j: (0, j)),
                pl.BlockSpec((1, tv_eff), lambda i, j: (0, j)),
            ],
            out_specs=pl.BlockSpec((tm_eff, 1), lambda i, j: (i, 0)),
            scratch_shapes=[pltpu.VMEM((tm_eff, 1), jnp.float32),   # running max
                            pltpu.VMEM((tm_eff, 1), jnp.float32)],  # running sum
        ),
        compiler_params=pltpu.CompilerParams(
            dimension_semantics=("parallel", "arbitrary"),
            vmem_limit_bytes=VMEM_LIMIT),
        cost_estimate=pl.CostEstimate(
            flops=2 * n_rows * d_model * vocab,
            transcendentals=n_rows * vocab,
            bytes_accessed=x_bytes + n_rtiles * w_bytes + n_rows * 4),
    )(x2d, w_t, b2d)

    # ---------------- pass 2: write log-softmax ----------------
    out = pl.pallas_call(
        _normalize_kernel,
        out_shape=jax.ShapeDtypeStruct((n_rows, vocab), out_dtype),
        grid_spec=pltpu.PrefetchScalarGridSpec(
            num_scalar_prefetch=0,
            grid=(n_vtiles, n_rtiles),   # vocab OUTER -> each weight tile DMA'd once
            in_specs=[
                pl.BlockSpec((tm_eff, d_model), lambda j, i: (i, 0)),
                pl.BlockSpec((d_model, tv_eff), lambda j, i: (0, j)),
                pl.BlockSpec((1, tv_eff), lambda j, i: (0, j)),
                pl.BlockSpec((tm_eff, 1), lambda j, i: (i, 0)),
            ],
            out_specs=pl.BlockSpec((tm_eff, tv_eff), lambda j, i: (i, j)),
        ),
        compiler_params=pltpu.CompilerParams(
            dimension_semantics=("parallel", "parallel"),
            vmem_limit_bytes=VMEM_LIMIT),
        cost_estimate=pl.CostEstimate(
            flops=2 * n_rows * d_model * vocab,
            transcendentals=0,
            bytes_accessed=(n_vtiles * x_bytes + w_bytes
                            + n_rows * vocab * jnp.dtype(out_dtype).itemsize)),
    )(x2d, w_t, b2d, lse)

    return out.reshape(*orig_shape[:-1], vocab)


if __name__ == "__main__":
    # small shapes consistent with the module
    batch, seq, d_model, vocab = 2, 8, 32, 128

    key = jax.random.PRNGKey(0)
    kx, kw, kb = jax.random.split(key, 3)

    bound = 1.0 / (d_model ** 0.5)
    weight = jax.random.uniform(kw, (vocab, d_model), jnp.float32, -bound, bound)
    bias = jax.random.uniform(kb, (vocab,), jnp.float32, -bound, bound)
    x = jax.random.normal(kx, (batch, seq, d_model), jnp.float32)

    # store the projection weight pre-transposed ONCE, outside the forward pass
    w_t = jnp.asarray(weight.T)           # [d_model, vocab]

    fwd = jax.jit(generator_forward)
    y = fwd(x, w_t, bias)
    jax.block_until_ready(y)
    assert y.shape == (batch, seq, vocab)
    assert y.dtype == x.dtype

    # tight check against a reference using the same bf16 matmul / f32 softmax math
    logits_ref = jnp.dot(x.reshape(-1, d_model).astype(jnp.bfloat16),
                         w_t.astype(jnp.bfloat16),
                         preferred_element_type=jnp.float32) + bias
    ref = jax.nn.log_softmax(logits_ref, axis=-1).reshape(batch, seq, vocab)
    assert jnp.allclose(y.astype(jnp.float32), ref, atol=3e-5, rtol=3e-5)

    # loose check against the full-f32 PyTorch-equivalent forward
    ref_f32 = jax.nn.log_softmax(x @ weight.T + bias, axis=-1)
    assert jnp.allclose(y.astype(jnp.float32), ref_f32, atol=5e-2, rtol=5e-2)

    print("KERNEL_OK")
</pallas_src>

<mosaic_0001>
module attributes {stable_mosaic.version = 11 : i64} {
  func.func @_normalize_kernel(%arg0: i32, %arg1: i32, %arg2: memref<16x32xbf16, #tpu.memory_space<vmem>>, %arg3: memref<32x128xbf16, #tpu.memory_space<vmem>>, %arg4: memref<1x128xf32, #tpu.memory_space<vmem>>, %arg5: memref<16x1xf32, #tpu.memory_space<vmem>>, %arg6: memref<16x128xf32, #tpu.memory_space<vmem>>) attributes {dimension_semantics = [#tpu.dimension_semantics<parallel>, #tpu.dimension_semantics<parallel>], iteration_bounds = array<i64: 1, 1>, scalar_prefetch = 0 : i64, scratch_operands = 0 : i64, tpu.core_type = #tpu.core_type<tc>, window_params = [{transform_indices = @transform_0, window_bounds = array<i64: 16, 32>}, {transform_indices = @transform_1, window_bounds = array<i64: 32, 128>}, {transform_indices = @transform_2, window_bounds = array<i64: 1, 128>}, {transform_indices = @transform_3, window_bounds = array<i64: 16, 1>}, {transform_indices = @transform_4, window_bounds = array<i64: 16, 128>}]} {
    %c0 = arith.constant 0 : index
    %c0_0 = arith.constant 0 : index
    %0 = vector.load %arg2[%c0, %c0_0] : memref<16x32xbf16, #tpu.memory_space<vmem>>, vector<16x32xbf16>
    %c0_1 = arith.constant 0 : index
    %c0_2 = arith.constant 0 : index
    %1 = vector.load %arg3[%c0_1, %c0_2] : memref<32x128xbf16, #tpu.memory_space<vmem>>, vector<32x128xbf16>
    %cst = arith.constant dense<0.000000e+00> : vector<16x128xf32>
    %2 = tpu.matmul %0, %1, %cst {dimension_numbers = #tpu.dot_dimension_numbers<[1], [0], [0], [1], [0, 0, 1, 1], [], []>} : vector<16x32xbf16>, vector<32x128xbf16>, vector<16x128xf32> -> vector<16x128xf32>
    %c0_3 = arith.constant 0 : index
    %c0_4 = arith.constant 0 : index
    %3 = vector.load %arg4[%c0_3, %c0_4] : memref<1x128xf32, #tpu.memory_space<vmem>>, vector<1x128xf32>
    %4 = vector.broadcast %3 : vector<1x128xf32> to vector<16x128xf32>
    %5 = arith.addf %2, %4 : vector<16x128xf32>
    %c0_5 = arith.constant 0 : index
    %c0_6 = arith.constant 0 : index
    %6 = vector.load %arg5[%c0_5, %c0_6] : memref<16x1xf32, #tpu.memory_space<vmem>>, vector<16x1xf32>
    %7 = vector.broadcast %6 : vector<16x1xf32> to vector<16x128xf32>
    %8 = arith.subf %5, %7 : vector<16x128xf32>
    %c0_7 = arith.constant 0 : index
    %c0_8 = arith.constant 0 : index
    %9 = vector.load %arg6[%c0_7, %c0_8] : memref<16x128xf32, #tpu.memory_space<vmem>>, vector<16x128xf32>
    tpu.vector_store %arg6[%c0_7, %c0_8], %8 {strides = array<i32>} : memref<16x128xf32, #tpu.memory_space<vmem>>, vector<16x128xf32>,
    return
  }
  func.func @transform_0(%arg0: i32, %arg1: i32) -> (i32, i32) {
    %c0_i32 = arith.constant 0 : i32
    %c0_i32_0 = arith.constant 0 : i32
    return %arg1, %c0_i32 : i32, i32
  }
  func.func @transform_1(%arg0: i32, %arg1: i32) -> (i32, i32) {
    %c0_i32 = arith.constant 0 : i32
    %c0_i32_0 = arith.constant 0 : i32
    return %c0_i32, %arg0 : i32, i32
  }
  func.func @transform_2(%arg0: i32, %arg1: i32) -> (i32, i32) {
    %c0_i32 = arith.constant 0 : i32
    %c0_i32_0 = arith.constant 0 : i32
    return %c0_i32, %arg0 : i32, i32
  }
  func.func @transform_3(%arg0: i32, %arg1: i32) -> (i32, i32) {
    %c0_i32 = arith.constant 0 : i32
    %c0_i32_0 = arith.constant 0 : i32
    return %arg1, %c0_i32 : i32, i32
  }
  func.func @transform_4(%arg0: i32, %arg1: i32) -> (i32, i32) {
    %c0_i32 = arith.constant 0 : i32
    return %arg1, %arg0 : i32, i32
  }
}

module attributes {stable_mosaic.version = 11 : i64} {
  func.func @kernel(%arg0: i32, %arg1: i32, %arg2: memref<16x32xbf16, #tpu.memory_space<vmem>>, %arg3: memref<32x128xbf16, #tpu.memory_space<vmem>>, %arg4: memref<1x128xf32, #tpu.memory_space<vmem>>, %arg5: memref<16x1xf32, #tpu.memory_space<vmem>>, %arg6: memref<16x1xf32, #tpu.memory_space<vmem>>, %arg7: memref<16x1xf32, #tpu.memory_space<vmem>>) attributes {dimension_semantics = [#tpu.dimension_semantics<parallel>, #tpu.dimension_semantics<arbitrary>], iteration_bounds = array<i64: 1, 1>, scalar_prefetch = 0 : i64, scratch_operands = 2 : i64, tpu.core_type = #tpu.core_type<tc>, window_params = [{transform_indices = @transform_0, window_bounds = array<i64: 16, 32>}, {transform_indices = @transform_1, window_bounds = array<i64: 32, 128>}, {transform_indices = @transform_2, window_bounds = array<i64: 1, 128>}, {transform_indices = @transform_3, window_bounds = array<i64: 16, 1>}]} {
    %c0_i32 = arith.constant 0 : i32
    %0 = arith.cmpi eq, %arg1, %c0_i32 : i32
    %1 = arith.extui %0 : i1 to i32
    %c0_i32_0 = arith.constant 0 : i32
    %2 = arith.cmpi ne, %1, %c0_i32_0 : i32
    scf.if %2 {
      %cst_18 = arith.constant -1.000000e+30 : f32
      %28 = vector.broadcast %cst_18 : f32 to vector<16x1xf32>
      %c0_19 = arith.constant 0 : index
      %c0_20 = arith.constant 0 : index
      %29 = vector.load %arg6[%c0_19, %c0_20] : memref<16x1xf32, #tpu.memory_space<vmem>>, vector<16x1xf32>
      tpu.vector_store %arg6[%c0_19, %c0_20], %28 {strides = array<i32>} : memref<16x1xf32, #tpu.memory_space<vmem>>, vector<16x1xf32>,
      %cst_21 = arith.constant 0.000000e+00 : f32
      %30 = vector.broadcast %cst_21 : f32 to vector<16x1xf32>
      %c0_22 = arith.constant 0 : index
      %c0_23 = arith.constant 0 : index
      %31 = vector.load %arg7[%c0_22, %c0_23] : memref<16x1xf32, #tpu.memory_space<vmem>>, vector<16x1xf32>
      tpu.vector_store %arg7[%c0_22, %c0_23], %30 {strides = array<i32>} : memref<16x1xf32, #tpu.memory_space<vmem>>, vector<16x1xf32>,
    } else {
    }
    %c0 = arith.constant 0 : index
    %c0_1 = arith.constant 0 : index
    %3 = vector.load %arg2[%c0, %c0_1] : memref<16x32xbf16, #tpu.memory_space<vmem>>, vector<16x32xbf16>
    %c0_2 = arith.constant 0 : index
    %c0_3 = arith.constant 0 : index
    %4 = vector.load %arg3[%c0_2, %c0_3] : memref<32x128xbf16, #tpu.memory_space<vmem>>, vector<32x128xbf16>
    %cst = arith.constant dense<0.000000e+00> : vector<16x128xf32>
    %5 = tpu.matmul %3, %4, %cst {dimension_numbers = #tpu.dot_dimension_numbers<[1], [0], [0], [1], [0, 0, 1, 1], [], []>} : vector<16x32xbf16>, vector<32x128xbf16>, vector<16x128xf32> -> vector<16x128xf32>
    %c0_4 = arith.constant 0 : index
    %c0_5 = arith.constant 0 : index
    %6 = vector.load %arg4[%c0_4, %c0_5] : memref<1x128xf32, #tpu.memory_space<vmem>>, vector<1x128xf32>
    %7 = vector.broadcast %6 : vector<1x128xf32> to vector<16x128xf32>
    %8 = arith.addf %5, %7 : vector<16x128xf32>
    %c0_6 = arith.constant 0 : index
    %c0_7 = arith.constant 0 : index
    %9 = vector.load %arg6[%c0_6, %c0_7] : memref<16x1xf32, #tpu.memory_space<vmem>>, vector<16x1xf32>
    %cst_8 = arith.constant dense<0xFF800000> : vector<16xf32>
    %10 = vector.multi_reduction <maximumf>, %8, %cst_8 [1] : vector<16x128xf32> to vector<16xf32>
    %11 = vector.shape_cast %10 : vector<16xf32> to vector<16x1xf32>
    %12 = arith.maximumf %9, %11 : vector<16x1xf32>
    %13 = arith.subf %9, %12 : vector<16x1xf32>
    %14 = math.exp %13 : vector<16x1xf32>
    %c0_9 = arith.constant 0 : index
    %c0_10 = arith.constant 0 : index
    %15 = vector.load %arg7[%c0_9, %c0_10] : memref<16x1xf32, #tpu.memory_space<vmem>>, vector<16x1xf32>
    %16 = arith.mulf %14, %15 : vector<16x1xf32>
    %17 = vector.broadcast %12 : vector<16x1xf32> to vector<16x128xf32>
    %18 = arith.subf %8, %17 : vector<16x128xf32>
    %19 = math.exp %18 : vector<16x128xf32>
    %cst_11 = arith.constant dense<0.000000e+00> : vector<16xf32>
    %20 = vector.multi_reduction <add>, %19, %cst_11 [1] : vector<16x128xf32> to vector<16xf32>
    %21 = vector.shape_cast %20 : vector<16xf32> to vector<16x1xf32>
    %22 = arith.addf %16, %21 : vector<16x1xf32>
    %c0_12 = arith.constant 0 : index
    %c0_13 = arith.constant 0 : index
    %23 = vector.load %arg7[%c0_12, %c0_13] : memref<16x1xf32, #tpu.memory_space<vmem>>, vector<16x1xf32>
    tpu.vector_store %arg7[%c0_12, %c0_13], %22 {strides = array<i32>} : memref<16x1xf32, #tpu.memory_space<vmem>>, vector<16x1xf32>,
    %c0_14 = arith.constant 0 : index
    %c0_15 = arith.constant 0 : index
    %24 = vector.load %arg6[%c0_14, %c0_15] : memref<16x1xf32, #tpu.memory_space<vmem>>, vector<16x1xf32>
    tpu.vector_store %arg6[%c0_14, %c0_15], %12 {strides = array<i32>} : memref<16x1xf32, #tpu.memory_space<vmem>>, vector<16x1xf32>,
    %c0_i32_16 = arith.constant 0 : i32
    %25 = arith.cmpi eq, %arg1, %c0_i32_16 : i32
    %26 = arith.extui %25 : i1 to i32
    %c0_i32_17 = arith.constant 0 : i32
    %27 = arith.cmpi ne, %26, %c0_i32_17 : i32
    scf.if %27 {
      %c0_18 = arith.constant 0 : index
      %c0_19 = arith.constant 0 : index
      %28 = vector.load %arg6[%c0_18, %c0_19] : memref<16x1xf32, #tpu.memory_space<vmem>>, vector<16x1xf32>
      %c0_20 = arith.constant 0 : index
      %c0_21 = arith.constant 0 : index
      %29 = vector.load %arg7[%c0_20, %c0_21] : memref<16x1xf32, #tpu.memory_space<vmem>>, vector<16x1xf32>
      %30 = math.log %29 : vector<16x1xf32>
      %31 = arith.addf %28, %30 : vector<16x1xf32>
      %c0_22 = arith.constant 0 : index
      %c0_23 = arith.constant 0 : index
      %32 = vector.load %arg5[%c0_22, %c0_23] : memref<16x1xf32, #tpu.memory_space<vmem>>, vector<16x1xf32>
      tpu.vector_store %arg5[%c0_22, %c0_23], %31 {strides = array<i32>} : memref<16x1xf32, #tpu.memory_space<vmem>>, vector<16x1xf32>,
    } else {
    }
    return
  }
  func.func @transform_0(%arg0: i32, %arg1: i32) -> (i32, i32) {
    %c0_i32 = arith.constant 0 : i32
    %c0_i32_0 = arith.constant 0 : i32
    return %arg0, %c0_i32 : i32, i32
  }
  func.func @transform_1(%arg0: i32, %arg1: i32) -> (i32, i32) {
    %c0_i32 = arith.constant 0 : i32
    %c0_i32_0 = arith.constant 0 : i32
    return %c0_i32, %arg1 : i32, i32
  }
  func.func @transform_2(%arg0: i32, %arg1: i32) -> (i32, i32) {
    %c0_i32 = arith.constant 0 : i32
    %c0_i32_0 = arith.constant 0 : i32
    return %c0_i32, %arg1 : i32, i32
  }
  func.func @transform_3(%arg0: i32, %arg1: i32) -> (i32, i32) {
    %c0_i32 = arith.constant 0 : i32
    %c0_i32_0 = arith.constant 0 : i32
    return %arg0, %c0_i32 : i32, i32
  }
}

</mosaic_0001>

<bundles_post_ra>
// kernel: generator_forward.2
= control target key start
LH: loop header
LB: loop body
LE: loop exit
PB: predicated region body
PF: predicated region fallthrough
CT: control target
= control target key end

     0   :  { %8 = vsyncpa [#allocation5], 0  ;;  %s453_s0 = inlined_call_operand.hbm [shape: bf16[16,32], index: 0, kind: input, shape index: {}]   ;;  %s454_s1 = inlined_call_operand.hbm [shape: bf16[32,128], index: 1, kind: input, shape index: {}]   ;;  %s455_s2 = inlined_call_operand.hbm [shape: f32[1,128], index: 2, kind: input, shape index: {}]   ;;  %s456_s3 = inlined_call_operand.hbm [shape: f32[16,1], index: 3, kind: output, shape index: {}]  }
   0x1   :  { %9 = vsyncpa [#allocation8], 0 }
   0x2   :  { %10 = vsyncpa [#allocation6], 0  ;;  %s356_s12 = smov [#allocation7]   ;;  %s357_s14 = smov [#allocation4]  }
   0x3   :  { %s28_s13 = sshll.u32 %s356_s12, 4  ;;  %s16_s15 = sshll.u32 %s357_s14, 4  ;;  %s29_s13 = int_to_ptr.vmem [resolvable:$true] %s28_s13  ;;  %s388_s15 = int_to_ptr.vmem [resolvable:$true] %s16_s15 }
   0x4   :  { %s262_s18 = scalar_lea.hbm %s454_s1, 256 }
   0x5   :  { %p263_p0 = scmp.ne.s32.totalorder %s454_s1, %s262_s18  ;;  %p266_p1 = scmp.lt.u32.totalorder %s262_s18, %s454_s1 }
   0x7   :  { %p268_p2 = pnand %p266_p1, %p263_p0 }
   0x9   :  { %271 = shalt.err (!%p268_p2)
}
   0xa   :  { %s272_s23 = scalar_lea.vmem %s29_s13, 256  ;;  %p277_p4 = scmp.lt.s32.totalorder %s29_s13, %s29_s13 }
   0xb   :  { %p273_p3 = scmp.ne.s32.totalorder %s29_s13, %s272_s23  ;;  %p278_p5 = scmp.lt.s32.totalorder %s272_s23, %s272_s23 }
   0xd   :  { %p279_p6 = por %p278_p5, %p277_p4 }
   0xf   :  { %p280_p7 = pnand %p279_p6, %p273_p3 }
  0x11   :  { %283 = shalt.err (!%p280_p7)
}
  0x12   :  { %s358_s24 = smov 64   ;;  %s359_s25 = smov 4  }
  0x13   :  { %34 = dma.hbm_to_vmem [thread:$0]  %s454_s1, 256, %s29_s13, [#allocation8], %s358_s24, %s358_s24, %s359_s25  }
  0x14   :  { %s284_s30 = scalar_lea.hbm %s453_s0, 128 }
  0x15   :  { %p285_p8 = scmp.ne.s32.totalorder %s453_s0, %s284_s30  ;;  %p288_p9 = scmp.lt.u32.totalorder %s284_s30, %s453_s0 }
  0x17   :  { %p290_p10 = pnand %p288_p9, %p285_p8 }
  0x19   :  { %293 = shalt.err (!%p290_p10)
}
  0x1a   :  { %s294_s8 = scalar_lea.vmem %s388_s15, 128  ;;  %p299_p12 = scmp.lt.s32.totalorder %s388_s15, %s388_s15 }
  0x1b   :  { %p295_p11 = scmp.ne.s32.totalorder %s388_s15, %s294_s8  ;;  %p300_p13 = scmp.lt.s32.totalorder %s294_s8, %s294_s8 }
  0x1d   :  { %p301_p0 = por %p300_p13, %p299_p12 }
  0x1f   :  { %p302_p1 = pnand %p301_p0, %p295_p11 }
  0x21   :  { %305 = shalt.err (!%p302_p1)
}
  0x22   :  { %22 = dma.hbm_to_vmem [thread:$0]  %s453_s0, 128, %s388_s15, [#allocation5], %s358_s24, %s358_s24, %s359_s25  }
  0x23   :  { %s360_s10 = smov [#allocation9]   ;;  %s306_s14 = scalar_lea.hbm %s455_s2, 16 }
  0x24   :  { %s41_s11 = sshll.u32 %s360_s10, 4  ;;  %p307_p2 = scmp.ne.s32.totalorder %s455_s2, %s306_s14  ;;  %s42_s11 = int_to_ptr.vmem [resolvable:$true] %s41_s11 }
  0x25   :  { %p310_p3 = scmp.lt.u32.totalorder %s306_s14, %s455_s2 }
  0x27   :  { %p312_p4 = pnand %p310_p3, %p307_p2 }
  0x29   :  { %315 = shalt.err (!%p312_p4)
}
  0x2a   :  { %s316_s20 = scalar_lea.vmem %s42_s11, 16  ;;  %s320_s0 = scalar_lea.vmem %s42_s11, 32 }
  0x2b   :  { %p317_p5 = scmp.ne.s32.totalorder %s42_s11, %s316_s20  ;;  %p321_p6 = scmp.lt.s32.totalorder %s42_s11, %s42_s11 }
  0x2c   :  { %p322_p7 = scmp.lt.s32.totalorder %s320_s0, %s316_s20 }
  0x2e   :  { %p323_p8 = por %p322_p7, %p321_p6 }
  0x30   :  { %p324_p9 = pnand %p323_p8, %p317_p5 }
  0x32   :  { %327 = shalt.err (!%p324_p9)
}
  0x33   :  { %44 = dma.hbm_to_vmem [thread:$0]  %s455_s2, 16, %s42_s11, [#allocation8]  }
  0x34   :  { %350 = dma.done.wait [#allocation5], 128  }
  0x35   :  { %351 = vsyncadd [#allocation5], 4294967168 }
  0x36   :  { %352 = dma.done.wait [#allocation8], 272  }
  0x37   :  { %353 = vsyncadd [#allocation8], 4294967024  ;;  %vm59_vm0 = vcmask 7168   ;;  %v361_v0 = vmov 0.0   ;;  %vm362_vm1 = vmmov 0   ;;  %v247_v1 = vld [vmem:[#allocation7] sm:$0xff]  }
  0x38   :  { %62 = vst.msk [vmem:[#allocation3] sm:$0xff] %vm59_vm0, %v361_v0  ;;  %63 = vst.msk [vmem:[#allocation3 + $0x8] sm:$0xff] %vm59_vm0, %v361_v0  ;;  %225 = vmatprep.subr.bf16.mxu0 %v361_v0  ;;  %229 = vmatprep.mubr.msk.bf16.mxu0 %vm362_vm1, %v361_v0  ;;  %v248_v2 = vld [vmem:[#allocation7 + $0x8] sm:$0xff]   ;;  %v249_v3 = vld [vmem:[#allocation4] sm:$0xff]   ;;  %vm94_vm2 = vcmask 261120   ;;  %v364_v12 = vmov 0  }
  0x39   :  { %226 = vmatpush3.bf16.msra.mxu0 %v247_v1  ;;  %v363_v4 = vmov -1e+30   ;;  %v217_v5 = vld [vmem:[#allocation9] ss:$0 sm:$0xff]  ;;  %245 = vset.pattern.permute.xlu1 %v364_v12  ;;  %s365_s2 = smov [#allocation10]  }
  0x3a   :  { %227 = vmatprep.subr.bf16.mxu0 %v361_v0  ;;  %60 = vst.msk [vmem:[#allocation2] sm:$0xff] %vm59_vm0, %v363_v4  ;;  %61 = vst.msk [vmem:[#allocation2 + $0x8] sm:$0xff] %vm59_vm0, %v363_v4  ;;  %246 = vset.pattern.permute.xlu0 %v364_v12  ;;  %s204_s22 = sshll.u32 %s365_s2, 4  ;;  %s205_s22 = int_to_ptr.vmem [resolvable:$true] %s204_s22 }
  0x3b   :  { %s328_s23 = scalar_lea.vmem %s205_s22, 256  ;;  %p333_p11 = scmp.lt.s32.totalorder %s205_s22, %s205_s22 }
  0x3c   :  { %p329_p10 = scmp.ne.s32.totalorder %s205_s22, %s328_s23  ;;  %p334_p12 = scmp.lt.s32.totalorder %s328_s23, %s328_s23 }
  0x3d   :  { %228 = vmatpush3.bf16.msra.mxu0 %v248_v2 }
  0x3e   :  { %p335_p13 = por %p334_p12, %p333_p11 }
  0x3f   :  { %v153_v32 = vld [vmem:[#allocation3] sm:$0xff]  ;;  %v154_v36 = vld [vmem:[#allocation3 + $0x8] sm:$0xff] }
  0x40   :  { %230 = vmatmul.mubr.msk.bf16.vlgmr.msra.gmra.mrb[0].mxu0 %vm94_vm2, %v249_v3  ;;  %p336_p0 = pnand %p335_p13, %p329_p10 }
  0x41   :  { %v139_v13 = vld [vmem:[#allocation2] sm:$0xff]  ;;  %v140_v16 = vld [vmem:[#allocation2 + $0x8] sm:$0xff] }
 0x113   :  { %v132_v6 = vpop.f32.mrb[0].mxu0 }
 0x114   :  { %v133_v7 = vadd.f32 %v217_v5, %v132_v6  ;;  %v231_v8 = vpop.f32.mrb[1].mxu0 }
 0x115   :  { %v135_v9 = vpop.f32.mrb[2].mxu0 }
 0x116   :  { %141 = vmax.xlane.f32.xlu0 %v133_v7  ;;  %v232_v10 = vpop.f32.mrb[3].mxu0  ;;  %v136_v11 = vadd.f32 %v217_v5, %v135_v9 }
 0x11a   :  { %143 = vmax.xlane.f32.xlu0 %v136_v11 }
 0x1a3   :  { %v142_v14 = vpop.xlane.xlu0 %141 }
 0x1a4   :  { %v145_v15 = vmax.f32 %v139_v13, %v142_v14 }
 0x1a6   :  { %v147_v17 = vsub.f32 %v139_v13, %v145_v15  ;;  %182 = vst.msk [vmem:[#allocation2] sm:$0xff] %vm59_vm0, %v145_v15  ;;  %159 = vperm.xlu1 %245, %v145_v15  }
 0x1a7   :  { %v144_v18 = vpop.xlane.xlu0 %143 }
 0x1a8   :  { %v146_v19 = vmax.f32 %v140_v16, %v144_v18  ;;  %v149_v29 = vmul.f32 1.442695, %v147_v17 }
 0x1aa   :  { %v148_v20 = vsub.f32 %v140_v16, %v146_v19  ;;  %183 = vst.msk [vmem:[#allocation2 + $0x8] sm:$0xff] %vm59_vm0, %v146_v19  ;;  %164 = vperm.xlu1 %245, %v146_v19  }
 0x1ac   :  { %v151_v30 = vmul.f32 1.442695, %v148_v20 }
 0x1ad   :  { %v187_v45 = vld [vmem:[#allocation2] sm:$0xff] }
 0x1b1   :  { %v188_v49 = vld [vmem:[#allocation2 + $0x8] sm:$0xff] }
 0x225   :  { %v160_v21 = vpop.permute.xlu1 %159 }
 0x226   :  { %v167_v22 = vsub.f32 %v133_v7, %v160_v21 }
 0x228   :  { %v169_v23 = vmul.f32 1.442695, %v167_v22 }
 0x229   :  { %v165_v24 = vpop.permute.xlu1 %164 }
 0x22a   :  { %250 = vpow2.f32 %v169_v23  ;;  %v168_v25 = vsub.f32 %v136_v11, %v165_v24 }
 0x22c   :  { %v171_v26 = vmul.f32 1.442695, %v168_v25 }
 0x22e   :  { %252 = vpow2.f32 %v171_v26 }
 0x22f   :  { %254 = vpow2.f32 %v149_v29 }
 0x230   :  { %256 = vpow2.f32 %v151_v30 }
 0x234   :  { %v251_v27 = vpop.eup %250 }
 0x235   :  { %173 = vadd.xlane.f32.xlu0 %v251_v27 }
 0x238   :  { %v253_v28 = vpop.eup %252 }
 0x239   :  { %175 = vadd.xlane.f32.xlu1 %v253_v28  ;;  %v255_v31 = vpop.eup %254 }
 0x23a   :  { %v155_v33 = vmul.f32 %v255_v31, %v153_v32  ;;  %v257_v34 = vpop.eup %256 }
 0x23b   :  { %v156_v38 = vmul.f32 %v257_v34, %v154_v36 }
 0x2c2   :  { %v174_v35 = vpop.xlane.xlu0 %173 }
 0x2c3   :  { %v177_v37 = vadd.f32 %v174_v35, %v155_v33 }
 0x2c5   :  { %180 = vst.msk [vmem:[#allocation3] sm:$0xff] %vm59_vm0, %v177_v37 }
 0x2c6   :  { %v176_v39 = vpop.xlane.xlu1 %175 }
 0x2c7   :  { %v178_v40 = vadd.f32 %v176_v39, %v156_v38 }
 0x2c9   :  { %181 = vst.msk [vmem:[#allocation3 + $0x8] sm:$0xff] %vm59_vm0, %v178_v40 }
 0x2cc   :  { %v189_v41 = vld [vmem:[#allocation3] sm:$0xff] }
 0x2cd   :  { %258 = vlog2.f32 %v189_v41 }
 0x2d0   :  { %v190_v42 = vld [vmem:[#allocation3 + $0x8] sm:$0xff] }
 0x2d1   :  { %260 = vlog2.f32 %v190_v42 }
 0x2d7   :  { %v259_v43 = vpop.eup %258 }
 0x2d8   :  { %v192_v44 = vmul.f32 0.6931472, %v259_v43 }
 0x2da   :  { %v195_v46 = vadd.f32 %v192_v44, %v187_v45 }
 0x2db   :  { %v261_v47 = vpop.eup %260 }
 0x2dc   :  { %v194_v48 = vmul.f32 0.6931472, %v261_v47  ;;  %197 = vst.msk [vmem:[#allocation10] sm:$0xff] %vm59_vm0, %v195_v46 }
 0x2de   :  { %v196_v50 = vadd.f32 %v194_v48, %v188_v49 }
 0x2e0   :  { %198 = vst.msk [vmem:[#allocation10 + $0x8] sm:$0xff] %vm59_vm0, %v196_v50 }
 0x2e1   :  { %339 = shalt.err (!%p336_p0)
}
 0x2e2   :  { %s340_s26 = scalar_lea.hbm %s456_s3, 256 }
 0x2e3   :  { %p341_p1 = scmp.ne.s32.totalorder %s456_s3, %s340_s26  ;;  %p344_p2 = scmp.lt.u32.totalorder %s340_s26, %s456_s3 }
 0x2e5   :  { %p346_p3 = pnand %p344_p2, %p341_p1 }
 0x2e7   :  { %349 = shalt.err (!%p346_p3)
}
 0x2e8   :  { %s366_s4 = smov 128   ;;  %s367_s5 = smov 8  }
 0x2e9   :  { %210 = dma.vmem_to_hbm [thread:$0]  %s205_s22, 256, %s456_s3, [#allocation6], %s366_s4, %s366_s4, %s367_s5  }
 0x2ea   :  { %354 = dma.done.wait [#allocation6], 256  }
 0x2eb   :  { %355 = vsyncadd [#allocation6], 4294967040 }
 0x2ec   :  { %214 = vsyncpa [#allocation5], 1 }
 0x2ed   :  { %215 = vsyncpa [#allocation8], 1 }
 0x2ee   :  { %216 = vsyncpa [#allocation6], 1 }

// kernel: generator_forward.3
= control target key start
LH: loop header
LB: loop body
LE: loop exit
PB: predicated region body
PF: predicated region fallthrough
CT: control target
= control target key end

     0   :  { %9 = vsyncpa [#allocation3], 0  ;;  %s449_s0 = inlined_call_operand.hbm [shape: bf16[16,32], index: 0, kind: input, shape index: {}]   ;;  %s450_s1 = inlined_call_operand.hbm [shape: bf16[32,128], index: 1, kind: input, shape index: {}]   ;;  %s451_s2 = inlined_call_operand.hbm [shape: f32[1,128], index: 2, kind: input, shape index: {}]   ;;  %s452_s3 = inlined_call_operand.hbm [shape: f32[16,1], index: 3, kind: input, shape index: {}]   ;;  %s453_s4 = inlined_call_operand.hbm [shape: f32[16,128], index: 4, kind: output, shape index: {}]  }
   0x1   :  { %10 = vsyncpa [#allocation6], 0 }
   0x2   :  { %11 = vsyncpa [#allocation9], 0 }
   0x3   :  { %12 = vsyncpa [#allocation4], 0  ;;  %s332_s15 = smov [#allocation5]   ;;  %s333_s17 = smov [#allocation2]  }
   0x4   :  { %s30_s16 = sshll.u32 %s332_s15, 4  ;;  %s18_s18 = sshll.u32 %s333_s17, 4  ;;  %s31_s16 = int_to_ptr.vmem [resolvable:$true] %s30_s16  ;;  %s369_s18 = int_to_ptr.vmem [resolvable:$true] %s18_s18 }
   0x5   :  { %s214_s21 = scalar_lea.hbm %s450_s1, 256 }
   0x6   :  { %p215_p0 = scmp.ne.s32.totalorder %s450_s1, %s214_s21  ;;  %p218_p1 = scmp.lt.u32.totalorder %s214_s21, %s450_s1 }
   0x8   :  { %p220_p2 = pnand %p218_p1, %p215_p0 }
   0xa   :  { %223 = shalt.err (!%p220_p2)
}
   0xb   :  { %s224_s26 = scalar_lea.vmem %s31_s16, 256  ;;  %p229_p4 = scmp.lt.s32.totalorder %s31_s16, %s31_s16 }
   0xc   :  { %p225_p3 = scmp.ne.s32.totalorder %s31_s16, %s224_s26  ;;  %p230_p5 = scmp.lt.s32.totalorder %s224_s26, %s224_s26 }
   0xe   :  { %p231_p6 = por %p230_p5, %p229_p4 }
  0x10   :  { %p232_p7 = pnand %p231_p6, %p225_p3 }
  0x12   :  { %235 = shalt.err (!%p232_p7)
}
  0x13   :  { %s334_s27 = smov 64   ;;  %s335_s28 = smov 4  }
  0x14   :  { %36 = dma.hbm_to_vmem [thread:$0]  %s450_s1, 256, %s31_s16, [#allocation6], %s334_s27, %s334_s27, %s335_s28  }
  0x15   :  { %s236_s7 = scalar_lea.hbm %s449_s0, 128 }
  0x16   :  { %p237_p8 = scmp.ne.s32.totalorder %s449_s0, %s236_s7  ;;  %p240_p9 = scmp.lt.u32.totalorder %s236_s7, %s449_s0 }
  0x18   :  { %p242_p10 = pnand %p240_p9, %p237_p8 }
  0x1a   :  { %245 = shalt.err (!%p242_p10)
}
  0x1b   :  { %s246_s12 = scalar_lea.vmem %s369_s18, 128  ;;  %p251_p12 = scmp.lt.s32.totalorder %s369_s18, %s369_s18 }
  0x1c   :  { %p247_p11 = scmp.ne.s32.totalorder %s369_s18, %s246_s12  ;;  %p252_p13 = scmp.lt.s32.totalorder %s246_s12, %s246_s12 }
  0x1e   :  { %p253_p0 = por %p252_p13, %p251_p12 }
  0x20   :  { %p254_p1 = pnand %p253_p0, %p247_p11 }
  0x22   :  { %257 = shalt.err (!%p254_p1)
}
  0x23   :  { %24 = dma.hbm_to_vmem [thread:$0]  %s449_s0, 128, %s369_s18, [#allocation3], %s334_s27, %s334_s27, %s335_s28  }
  0x24   :  { %s336_s14 = smov [#allocation7]   ;;  %s337_s16 = smov [#allocation8]  }
  0x25   :  { %s43_s15 = sshll.u32 %s336_s14, 4  ;;  %s52_s17 = sshll.u32 %s337_s16, 4  ;;  %s44_s15 = int_to_ptr.vmem [resolvable:$true] %s43_s15  ;;  %s400_s17 = int_to_ptr.vmem [resolvable:$true] %s52_s17 }
  0x26   :  { %s258_s21 = scalar_lea.hbm %s451_s2, 16 }
  0x27   :  { %p259_p2 = scmp.ne.s32.totalorder %s451_s2, %s258_s21  ;;  %p262_p3 = scmp.lt.u32.totalorder %s258_s21, %s451_s2 }
  0x29   :  { %p264_p4 = pnand %p262_p3, %p259_p2 }
  0x2b   :  { %267 = shalt.err (!%p264_p4)
}
  0x2c   :  { %s268_s0 = scalar_lea.vmem %s44_s15, 16  ;;  %s272_s18 = scalar_lea.vmem %s44_s15, 32 }
  0x2d   :  { %p269_p5 = scmp.ne.s32.totalorder %s44_s15, %s268_s0  ;;  %p273_p6 = scmp.lt.s32.totalorder %s44_s15, %s44_s15 }
  0x2e   :  { %p274_p7 = scmp.lt.s32.totalorder %s272_s18, %s268_s0 }
  0x30   :  { %p275_p8 = por %p274_p7, %p273_p6 }
  0x32   :  { %p276_p9 = pnand %p275_p8, %p269_p5 }
  0x34   :  { %279 = shalt.err (!%p276_p9)
}
  0x35   :  { %46 = dma.hbm_to_vmem [thread:$0]  %s451_s2, 16, %s44_s15, [#allocation6]  }
  0x36   :  { %s280_s30 = scalar_lea.hbm %s452_s3, 256 }
  0x37   :  { %p281_p10 = scmp.ne.s32.totalorder %s452_s3, %s280_s30  ;;  %p284_p11 = scmp.lt.u32.totalorder %s280_s30, %s452_s3 }
  0x39   :  { %p286_p12 = pnand %p284_p11, %p281_p10 }
  0x3b   :  { %289 = shalt.err (!%p286_p12)
}
  0x3c   :  { %s290_s9 = scalar_lea.vmem %s400_s17, 256  ;;  %p295_p0 = scmp.lt.s32.totalorder %s400_s17, %s400_s17 }
  0x3d   :  { %p291_p13 = scmp.ne.s32.totalorder %s400_s17, %s290_s9  ;;  %p296_p1 = scmp.lt.s32.totalorder %s290_s9, %s290_s9 }
  0x3f   :  { %p297_p2 = por %p296_p1, %p295_p0 }
  0x41   :  { %p298_p3 = pnand %p297_p2, %p291_p13 }
  0x43   :  { %301 = shalt.err (!%p298_p3)
}
  0x44   :  { %s338_s2 = smov 128   ;;  %s339_s10 = smov 8  }
  0x45   :  { %58 = dma.hbm_to_vmem [thread:$0]  %s452_s3, 256, %s400_s17, [#allocation9], %s338_s2, %s338_s2, %s339_s10  }
  0x46   :  { %324 = dma.done.wait [#allocation3], 128  }
  0x47   :  { %325 = vsyncadd [#allocation3], 4294967168 }
  0x48   :  { %326 = dma.done.wait [#allocation6], 272  }
  0x49   :  { %327 = vsyncadd [#allocation6], 4294967024 }
  0x4a   :  { %328 = dma.done.wait [#allocation9], 256  }
  0x4b   :  { %329 = vsyncadd [#allocation9], 4294967040  ;;  %v340_v0 = vmov 0.0   ;;  %vm341_vm0 = vmmov 0   ;;  %v342_v1 = vmov 0   ;;  %v211_v2 = vld [vmem:[#allocation5] sm:$0xff]  }
  0x4c   :  { %190 = vmatprep.subr.bf16.mxu0 %v340_v0  ;;  %194 = vmatprep.mubr.msk.bf16.mxu0 %vm341_vm0, %v340_v0  ;;  %v212_v3 = vld [vmem:[#allocation5 + $0x8] sm:$0xff]   ;;  %v147_v4 = vld [vmem:[#allocation8] sm:$0xff]  ;;  %v148_v6 = vld [vmem:[#allocation8 + $0x8] sm:$0xff]  ;;  %vm102_vm1 = vcmask 261120   ;;  %s343_s3 = smov [#allocation10]  }
  0x4d   :  { %210 = vset.pattern.permute.xlu0 %v342_v1  ;;  %191 = vmatpush3.bf16.msra.mxu0 %v211_v2  ;;  %v213_v5 = vld [vmem:[#allocation2] sm:$0xff]   ;;  %v182_v8 = vld [vmem:[#allocation7] ss:$0 sm:$0xff]  ;;  %s168_s1 = sshll.u32 %s343_s3, 4  ;;  %s169_s1 = int_to_ptr.vmem [resolvable:$true] %s168_s1 }
  0x4e   :  { %192 = vmatprep.subr.bf16.mxu0 %v340_v0  ;;  %151 = vperm.xlu0 %210, %v147_v4   ;;  %s302_s13 = scalar_lea.vmem %s169_s1, 256  ;;  %p307_p5 = scmp.lt.s32.totalorder %s169_s1, %s169_s1 }
  0x4f   :  { %p303_p4 = scmp.ne.s32.totalorder %s169_s1, %s302_s13  ;;  %p308_p6 = scmp.lt.s32.totalorder %s302_s13, %s302_s13 }
  0x51   :  { %193 = vmatpush3.bf16.msra.mxu0 %v212_v3  ;;  %p309_p7 = por %p308_p6, %p307_p5 }
  0x52   :  { %156 = vperm.xlu0 %210, %v148_v6  }
  0x53   :  { %p310_p8 = pnand %p309_p7, %p303_p4 }
  0x54   :  { %195 = vmatmul.mubr.msk.bf16.vlgmr.msra.gmra.mrb[0].mxu0 %vm102_vm1, %v213_v5 }
  0xcd   :  { %v152_v7 = vpop.permute.xlu0 %151 }
  0xd1   :  { %v157_v16 = vpop.permute.xlu0 %156 }
 0x127   :  { %v140_v9 = vpop.f32.mrb[0].mxu0 }
 0x128   :  { %v141_v10 = vadd.f32 %v182_v8, %v140_v9  ;;  %v196_v11 = vpop.f32.mrb[1].mxu0 }
 0x129   :  { %v143_v12 = vpop.f32.mrb[2].mxu0 }
 0x12a   :  { %v159_v13 = vsub.f32 %v141_v10, %v152_v7  ;;  %v144_v14 = vadd.f32 %v182_v8, %v143_v12  ;;  %v197_v15 = vpop.f32.mrb[3].mxu0 }
 0x12c   :  { %161 = vst [vmem:[#allocation10] sm:$0xff] %v159_v13  ;;  %v160_v17 = vsub.f32 %v144_v14, %v157_v16 }
 0x12e   :  { %162 = vst [vmem:[#allocation10 + $0x8] sm:$0xff] %v160_v17 }
 0x12f   :  { %313 = shalt.err (!%p310_p8)
}
 0x130   :  { %s314_s16 = scalar_lea.hbm %s453_s4, 256 }
 0x131   :  { %p315_p9 = scmp.ne.s32.totalorder %s453_s4, %s314_s16  ;;  %p318_p10 = scmp.lt.u32.totalorder %s314_s16, %s453_s4 }
 0x133   :  { %p320_p11 = pnand %p318_p10, %p315_p9 }
 0x135   :  { %323 = shalt.err (!%p320_p11)
}
 0x136   :  { %174 = dma.vmem_to_hbm [thread:$0]  %s169_s1, 256, %s453_s4, [#allocation4], %s338_s2, %s338_s2, %s339_s10  }
 0x137   :  { %330 = dma.done.wait [#allocation4], 256  }
 0x138   :  { %331 = vsyncadd [#allocation4], 4294967040 }
 0x139   :  { %178 = vsyncpa [#allocation3], 1 }
 0x13a   :  { %179 = vsyncpa [#allocation6], 1 }
 0x13b   :  { %180 = vsyncpa [#allocation9], 1 }
 0x13c   :  { %181 = vsyncpa [#allocation4], 1 }

</bundles_post_ra>
